<compile_context>
chip_gen: v5e
topology: v5e:2x2
jax: 0.10.0
libtpu: 0.0.40
codegen_flags: <defaults>
</compile_context>

<pallas_src>
import functools

import jax
import jax.numpy as jnp
from jax.experimental import pallas as pl
from jax.experimental.pallas import tpu as pltpu


def _vmem_capacity_bytes():
    """Best-effort query of per-core VMEM capacity; conservative (v7x) fallback."""
    try:
        info = pltpu.get_tpu_info()
        cap = getattr(info, "vmem_capacity_bytes", None)
        if cap:
            return int(cap)
    except Exception:
        pass
    return 64 << 20  # v7x-sized conservative fallback


def _layernorm_kernel(x_ref, ab_ref, o_ref, *, eps, features, approx):
    # x_ref: (tile_rows, features); ab_ref: (2, features) = [a2; b2]
    x = x_ref[...].astype(jnp.float32)

    # Single-pass statistics: one full-tile multiply + two lane-reduces.
    s1 = jnp.sum(x, axis=-1, keepdims=True)          # (tile, 1)
    s2 = jnp.sum(x * x, axis=-1, keepdims=True)      # (tile, 1)
    mean = s1 * jnp.float32(1.0 / features)
    # torch.std default: unbiased estimator (divide by N-1). Single-pass form:
    #   var = (sum(x^2) - sum(x)^2 / N) / (N - 1)
    # features == 1 -> 0/0 = NaN, matching torch; max() propagates NaN.
    var = (s2 - s1 * mean) / jnp.float32(features - 1)
    var = jnp.maximum(var, jnp.float32(0.0))          # guard f32 cancellation
    std = jnp.sqrt(var)

    # Reciprocal of the (tile_rows, 1) column; per-element work is then a broadcast
    # multiply instead of a full-tile divide. approx=True uses the EUP vrcp path.
    inv = pl.reciprocal(std + jnp.float32(eps), approx=approx)

    a = ab_ref[0:1, :].astype(jnp.float32)
    b = ab_ref[1:2, :].astype(jnp.float32)
    o_ref[...] = (a * ((x - mean) * inv) + b).astype(o_ref.dtype)


def layer_norm(x, a2, b2, eps=1000000.0, tile_rows=None, approx=False):
    """Transformer LayerNorm forward. x: (..., features). a2, b2: (features,)."""
    orig_shape = x.shape
    features = orig_shape[-1]
    x2d = x.reshape(-1, features)
    rows = x2d.shape[0]

    itemsize = jnp.dtype(x2d.dtype).itemsize
    # dtype-aware sublane multiple: 8 for 4-byte, 16 for 2-byte, 32 for 1-byte dtypes
    sublane = max(8, 32 // itemsize)

    vmem_cap = _vmem_capacity_bytes()

    # Per-row VMEM footprint: double-buffered input + output blocks plus the
    # in-kernel f32 up-cast temporaries (x, x*x, pre-cast result).
    per_row_bytes = 4 * features * itemsize + 12 * features
    vmem_budget = min(max(vmem_cap // 3, 8 << 20), 48 << 20)
    max_tile_by_vmem = max(sublane, (vmem_budget // per_row_bytes) // sublane * sublane)

    if tile_rows is None:
        # 4 MiB input blocks on 128-MiB-VMEM chips (v5e/v6e), 2 MiB on v7x (64 MiB);
        # halved for sub-4-byte dtypes because the kernel up-casts the tile to f32.
        target_block_bytes = (4 << 20) if vmem_cap >= (100 << 20) else (2 << 20)
        if itemsize < 4:
            target_block_bytes //= 2
        tile_rows = max(sublane, target_block_bytes // max(features * itemsize, 1))
        tile_rows = (tile_rows // sublane) * sublane
        tile_rows = min(tile_rows, 4096)
    else:
        tile_rows = max(sublane, (tile_rows // sublane) * sublane)
    tile_rows = min(tile_rows, max_tile_by_vmem)

    # Guarantee >= 2 grid steps whenever the row count allows it, so
    # dimension_semantics=("parallel",) can shard rows across v7x's two TensorCores.
    # On single-TC chips (v5e/v6e) the extra grid step costs ~0.35 us -> negligible.
    if tile_rows >= rows:
        if rows > sublane:
            half = -(-rows // 2)                         # ceil(rows / 2)
            tile_rows = -(-half // sublane) * sublane    # round up to sublane
        else:
            tile_rows = rows                             # single hardware row-tile

    # No host-side padding: cdiv grid; Pallas masks the partial tail block's writes
    # (rows are independent, so stale tail-block rows never contaminate valid rows).
    grid = (pl.cdiv(rows, tile_rows),)

    # Pack gamma/beta into one (2, features) operand: one DMA stream, one buffer pair.
    ab = jnp.stack([a2.reshape(features), b2.reshape(features)], axis=0)

    # Explicit VMEM budget: double-buffered in + out blocks, f32 up-cast temporaries,
    # params, plus headroom; capped below the chip's physical VMEM capacity.
    block_bytes = tile_rows * features * itemsize
    f32_tmp_bytes = 3 * tile_rows * features * 4
    param_bytes = 2 * features * jnp.dtype(ab.dtype).itemsize
    vmem_limit = 2 * 2 * block_bytes + f32_tmp_bytes + 2 * param_bytes + (4 << 20)
    vmem_limit = int(min(max(vmem_limit, 16 << 20), vmem_cap - (8 << 20)))

    kernel = functools.partial(
        _layernorm_kernel, eps=eps, features=features, approx=approx
    )

    out = pl.pallas_call(
        kernel,
        out_shape=jax.ShapeDtypeStruct((rows, features), x2d.dtype),
        grid_spec=pltpu.PrefetchScalarGridSpec(
            num_scalar_prefetch=0,
            grid=grid,
            in_specs=[
                pl.BlockSpec((tile_rows, features), lambda i: (i, 0)),
                pl.BlockSpec((2, features), lambda i: (0, 0)),
            ],
            out_specs=pl.BlockSpec((tile_rows, features), lambda i: (i, 0)),
        ),
        compiler_params=pltpu.CompilerParams(
            dimension_semantics=("parallel",),
            vmem_limit_bytes=vmem_limit,
        ),
    )(x2d, ab)

    return out.reshape(orig_shape)


def _reference(x, a2, b2, eps):
    x = x.astype(jnp.float32)
    mean = jnp.mean(x, axis=-1, keepdims=True)
    diff = x - mean
    var = jnp.sum(diff * diff, axis=-1, keepdims=True) / (x.shape[-1] - 1)
    std = jnp.sqrt(var)
    return a2 * diff / (std + eps) + b2


if __name__ == "__main__":
    key = jax.random.PRNGKey(0)
    batch, seq, d_model = 2, 8, 512  # d_model matches the module's size=512

    x = jax.random.normal(key, (batch, seq, d_model), dtype=jnp.float32)

    # Deterministic parameter init, matching nn.Parameter(torch.ones/zeros(features))
    a2 = jnp.ones((d_model,), dtype=jnp.float32)
    b2 = jnp.zeros((d_model,), dtype=jnp.float32)

    # Check 1: module's default eps (1e6 as written in the source). rows=16 ->
    # auto-split into 2 grid steps (exercises the v7x two-TC path). Exact reciprocal.
    eps = 1000000.0
    out = jax.block_until_ready(layer_norm(x, a2, b2, eps=eps))
    ref = _reference(x, a2, b2, eps)
    assert out.shape == x.shape
    assert jnp.allclose(out, ref, atol=1e-8, rtol=1e-4), "mismatch vs reference (eps=1e6)"

    # Check 2: multi-block grid with a masked partial tail block (300 rows, 96-row
    # tiles -> grid of 4), practically-sized eps, exact reciprocal.
    x2 = jax.random.normal(jax.random.PRNGKey(1), (3, 100, d_model), dtype=jnp.float32)
    out2 = jax.block_until_ready(
        layer_norm(x2, a2, b2, eps=1e-6, tile_rows=96, approx=False)
    )
    ref2 = _reference(x2, a2, b2, 1e-6)
    assert out2.shape == x2.shape
    assert jnp.allclose(out2, ref2, atol=1e-4, rtol=1e-4), "mismatch vs reference (eps=1e-6)"

    print("KERNEL_OK")
</pallas_src>

<mosaic_0001>
module attributes {stable_mosaic.version = 11 : i64} {
  func.func @_layernorm_kernel(%arg0: i32, %arg1: memref<8x512xf32, #tpu.memory_space<vmem>>, %arg2: memref<2x512xf32, #tpu.memory_space<vmem>>, %arg3: memref<8x512xf32, #tpu.memory_space<vmem>>) attributes {dimension_semantics = [#tpu.dimension_semantics<parallel>], iteration_bounds = array<i64: 2>, scalar_prefetch = 0 : i64, scratch_operands = 0 : i64, tpu.core_type = #tpu.core_type<tc>, window_params = [{transform_indices = @transform_0, window_bounds = array<i64: 8, 512>}, {pipeline_mode = #tpu.pipeline_mode<synchronous>, transform_indices = @transform_1, window_bounds = array<i64: 2, 512>}, {transform_indices = @transform_2, window_bounds = array<i64: 8, 512>}]} {
    %c0 = arith.constant 0 : index
    %c0_0 = arith.constant 0 : index
    %0 = vector.load %arg1[%c0, %c0_0] : memref<8x512xf32, #tpu.memory_space<vmem>>, vector<8x512xf32>
    %cst = arith.constant dense<0.000000e+00> : vector<8xf32>
    %1 = vector.multi_reduction <add>, %0, %cst [1] : vector<8x512xf32> to vector<8xf32>
    %2 = vector.shape_cast %1 : vector<8xf32> to vector<8x1xf32>
    %3 = arith.mulf %0, %0 : vector<8x512xf32>
    %cst_1 = arith.constant dense<0.000000e+00> : vector<8xf32>
    %4 = vector.multi_reduction <add>, %3, %cst_1 [1] : vector<8x512xf32> to vector<8xf32>
    %5 = vector.shape_cast %4 : vector<8xf32> to vector<8x1xf32>
    %cst_2 = arith.constant 0.001953125 : f32
    %6 = vector.broadcast %cst_2 : f32 to vector<8x1xf32>
    %7 = arith.mulf %2, %6 : vector<8x1xf32>
    %8 = arith.mulf %2, %7 : vector<8x1xf32>
    %9 = arith.subf %5, %8 : vector<8x1xf32>
    %cst_3 = arith.constant 5.110000e+02 : f32
    %10 = vector.broadcast %cst_3 : f32 to vector<8x1xf32>
    %11 = arith.divf %9, %10 : vector<8x1xf32>
    %cst_4 = arith.constant 0.000000e+00 : f32
    %12 = vector.broadcast %cst_4 : f32 to vector<8x1xf32>
    %13 = arith.maximumf %11, %12 : vector<8x1xf32>
    %14 = math.sqrt %13 : vector<8x1xf32>
    %cst_5 = arith.constant 1.000000e+06 : f32
    %15 = vector.broadcast %cst_5 : f32 to vector<8x1xf32>
    %16 = arith.addf %14, %15 : vector<8x1xf32>
    %17 = tpu.reciprocal %16 : vector<8x1xf32> -> vector<8x1xf32>
    %c0_6 = arith.constant 0 : index
    %c0_7 = arith.constant 0 : index
    %18 = vector.load %arg2[%c0_6, %c0_7] : memref<2x512xf32, #tpu.memory_space<vmem>>, vector<1x512xf32>
    %c1 = arith.constant 1 : index
    %c0_8 = arith.constant 0 : index
    %19 = vector.load %arg2[%c1, %c0_8] : memref<2x512xf32, #tpu.memory_space<vmem>>, vector<1x512xf32>
    %20 = vector.broadcast %7 : vector<8x1xf32> to vector<8x512xf32>
    %21 = arith.subf %0, %20 : vector<8x512xf32>
    %22 = vector.broadcast %17 : vector<8x1xf32> to vector<8x512xf32>
    %23 = arith.mulf %21, %22 : vector<8x512xf32>
    %24 = vector.broadcast %18 : vector<1x512xf32> to vector<8x512xf32>
    %25 = arith.mulf %24, %23 : vector<8x512xf32>
    %26 = vector.broadcast %19 : vector<1x512xf32> to vector<8x512xf32>
    %27 = arith.addf %25, %26 : vector<8x512xf32>
    %c0_9 = arith.constant 0 : index
    %c0_10 = arith.constant 0 : index
    %28 = vector.load %arg3[%c0_9, %c0_10] : memref<8x512xf32, #tpu.memory_space<vmem>>, vector<8x512xf32>
    tpu.vector_store %arg3[%c0_9, %c0_10], %27 {strides = array<i32>} : memref<8x512xf32, #tpu.memory_space<vmem>>, vector<8x512xf32>,
    return
  }
  func.func @transform_0(%arg0: i32) -> (i32, i32) {
    %c0_i32 = arith.constant 0 : i32
    %c0_i32_0 = arith.constant 0 : i32
    return %arg0, %c0_i32 : i32, i32
  }
  func.func @transform_1(%arg0: i32) -> (i32, i32) {
    %c0_i32 = arith.constant 0 : i32
    %c0_i32_0 = arith.constant 0 : i32
    %c0_i32_1 = arith.constant 0 : i32
    return %c0_i32, %c0_i32_0 : i32, i32
  }
  func.func @transform_2(%arg0: i32) -> (i32, i32) {
    %c0_i32 = arith.constant 0 : i32
    %c0_i32_0 = arith.constant 0 : i32
    return %arg0, %c0_i32 : i32, i32
  }
}

</mosaic_0001>

<bundles_post_ra>
// kernel: tpu_custom_call.1
= control target key start
LH: loop header
LB: loop body
LE: loop exit
PB: predicated region body
PF: predicated region fallthrough
CT: control target
= control target key end

     0   :  { %7 = vsyncpa [#allocation3], 0  ;;  %s769_s0 = inlined_call_operand.hbm [shape: f32[16,512], index: 0, kind: input, shape index: {}]   ;;  %s770_s1 = inlined_call_operand.hbm [shape: f32[2,512], index: 1, kind: input, shape index: {}]   ;;  %s771_s2 = inlined_call_operand.hbm [shape: f32[16,512], index: 2, kind: output, shape index: {}]  }
   0x1   :  { %9 = vsyncpa [#allocation3 + $0x1], 0 }
   0x2   :  { %10 = vsyncpa [#allocation6], 0 }
   0x3   :  { %11 = vsyncpa [#allocation4], 0 }
   0x4   :  { %13 = vsyncpa [#allocation4 + $0x1], 0  ;;  %s603_s9 = smov 0   ;;  %s605_s10 = smov 0  }
   0x5   :  { %s607_s11 = smov 0   ;;  %s609_s12 = smov 0  }
   0x6 LB: > { %s624_s13 = sadd.s32 4294967295, %s584_s12   ;;  %s372_s14 = sadd.s32 4294967294, %s584_s12   ;;  %s584_s12 = sphi %s609_s12, %s781_s12   ;;  %s580_s11 = sphi %s607_s11, %s780_s11   ;;  %s576_s10 = sphi %s605_s10, %s779_s10   ;;  %s572_s9 = sphi %s603_s9, %s778_s9  }
   0x7   : > { %p39_p0 = scmp.ne.s32.totalorder %s576_s10, %s572_s9  ;;  %p40_p1 = scmp.eq.s32.totalorder %s624_s13, 0 }
   0x8   : > { %p84_p2 = scmp.eq.s32.totalorder %s624_s13, 1  ;;  %p90_p3 = scmp.eq.s32.totalorder %s372_s14, 1 }
   0x9   : > { %p633_p4 = por %p40_p1, %p39_p0  ;;  %p373_p5 = scmp.ge.s32.totalorder %s584_s12, 1 }
   0xa   : > { %p638_p6 = por %p90_p3, %p39_p0  ;;  %p97_p7 = scmp.lt.s32.totalorder %s584_s12, 3 }
   0xb   : > { %s109_s19 = sshll.u32 %s770_s1, 4  ;;  %s586_s21 = smov [#allocation5]   ;;  %s110_s19 = int_to_ptr.hbm [resolvable:$true] %s109_s19 }
   0xc   : > { %p646_p8 = pnand %p373_p5, %p97_p7  ;;  %s111_s22 = sshll.u32 %s586_s21, 4  ;;  %s112_s22 = int_to_ptr.vmem [resolvable:$true] %s111_s22 }
   0xd   : > { %s656_s23 = sadd.s32 1, %s584_s12   ;;  %s26_s24 = sadd.s32 1, %s580_s11 }
   0xe   : > { %p398_p10 = pneg %p646_p8  ;;  %s23_s25 = ssub.s32 %s584_s12, %s656_s23 }
   0xf   : > { %p24_p12 = scmp.eq.s32.totalorder %s23_s25, 0  ;;  %p33_p13 = scmp.ne.s32.totalorder %s580_s11, %s576_s10 }
  0x10   : > { %p399_p11 = pnand %p398_p10, %p40_p1  ;;  %p34_p0 = scmp.eq.s32.totalorder %s584_s12, 0 }
  0x11   : > { %s665_s26 = scalar_select %p24_p12, %s580_s11, %s26_s24  }
  0x12   : > { %401 = dma.hbm_to_vmem [thread:$0]  (!%p399_p11), %s110_s19, 128, %s112_s22, [#allocation6]  }
  0x13   : > { %p669_p3 = por %p84_p2, %p33_p13  ;;  %p411_p5 = scmp.lt.s32.totalorder %s584_s12, 2 }
  0x14   : > { %s122_s28 = sand.u32 1, %s580_s11   ;;  %s388_s29 = sshll.u32 %s584_s12, 5 }
  0x15   : > { %p35_p7 = por %p34_p0, %p33_p13  ;;  %s376_s30 = sshll.u32 %s122_s28, 5 }
  0x16   : > { %s131_s5 = scalar_lea.hbm %s769_s0, %s388_s29  ;;  %s126_s7 = scalar_lea.vmem [#allocation2], %s376_s30 }
  0x17   : > { %s133_s6 = sshll.u32 %s131_s5, 4  ;;  %s135_s8 = sshll.u32 %s126_s7, 4  ;;  %s134_s6 = int_to_ptr.hbm [resolvable:$true] %s133_s6  ;;  %s136_s8 = int_to_ptr.vmem [resolvable:$true] %s135_s8 }
  0x18   : > { %p679_p10 = pnand %p411_p5, %p35_p7  ;;  %s123_s17 = scalar_lea.sflag [#allocation3], %s122_s28 }
  0x19   : > { %s484_s18 = sshra.s32 %s134_s6, 4  ;;  %s491_s24 = scalar_lea.hbm %s769_s0, 64  ;;  %s485_s18 = int_to_ptr.hbm [resolvable:$true] %s484_s18 }
  0x1a   : > { %s486_s19 = scalar_lea.hbm %s485_s18, 32  ;;  %p488_p11 = pneg %p679_p10 }
  0x1b   : > { %p487_p2 = scmp.ne.s32.totalorder %s485_s18, %s486_s19  ;;  %p492_p0 = scmp.lt.s32.totalorder %s485_s18, %s769_s0 }
  0x1c   : > { %p493_p5 = scmp.lt.s32.totalorder %s491_s24, %s486_s19 }
  0x1d   : > { %p489_p12 = pnand %p488_p11, %p487_p2 }
  0x1e   : > { %p494_p7 = por %p493_p5, %p492_p0 }
  0x1f   : > { %p490_p13 = pneg %p489_p12 }
  0x21   : > { %p495_p9 = pnand %p494_p7, %p490_p13 }
  0x23   : > { %498 = shalt.err (!%p495_p9)
}
  0x24   : > { %405 = dma.hbm_to_vmem [thread:$0]  (!%p679_p10), %s134_s6, 512, %s136_s8, %s123_s17  }
  0x25   : > { %144 = sbr.rel (%p646_p8) target bundleno = 234 (0xea), region = 28  ;;  %s696_s28 = sand.u32 (!%p646_p8), 1, %s576_s10  }
  0x26   : > { %s380_s30 = sshll.u32 (!%p646_p8), %s696_s28, 5  ;;  %s147_s3 = scalar_lea.sflag (!%p646_p8), [#allocation3], %s696_s28 }
  0x27   : > { %s150_s4 = scalar_lea.vmem (!%p646_p8), [#allocation2], %s380_s30 }
  0x2a   : > { %559 = dma.done.wait (%p633_p4), %s147_s3, 512  }
  0x2b   : > { %561 = vsyncadd (%p633_p4), %s147_s3, 4294966784 }
  0x2c   : > { %563 = dma.done.wait (%p40_p1), [#allocation6], 128  }
  0x2d   : > { %565 = vsyncadd (%p40_p1), [#allocation6], 4294967168  ;;  %v710_v0 = vld [vmem:[%s150_s4] sm:$0xff]  ;;  %v712_v1 = vld [vmem:[%s150_s4 + $0x8] sm:$0xff]  ;;  %v587_v14 = vmov 511.0   ;;  %s389_s15 = sshll.u32 %s624_s13, 5 }
  0x2e   : > { %v714_v2 = vld [vmem:[%s150_s4 + $0x10] sm:$0xff]  ;;  %v181_v3 = vadd.f32 %v712_v1, %v710_v0  ;;  %v186_v4 = vmul.f32 %v710_v0, %v710_v0  ;;  %v187_v5 = vmul.f32 %v712_v1, %v712_v1  ;;  %v722_v6 = vld [vmem:[%s150_s4 + $0x18] sm:$0xff]  ;;  %448 = vrcp.f32 %v587_v14  ;;  %v234_v45 = vld [vmem:[#allocation5] ss:$2 sm:$0xf]  ;;  %s287_s6 = scalar_lea.hbm %s771_s2, %s389_s15  ;;  %s176_s13 = scalar_lea.vmem [#allocation7], %s380_s30 }
  0x2f   : > { %v188_v8 = vmul.f32 %v714_v2, %v714_v2  ;;  %v189_v11 = vmul.f32 %v722_v6, %v722_v6  ;;  %v236_v50 = vld [vmem:[#allocation5 + $0x1] ss:$2 sm:$0xf]  ;;  %v246_v53 = vperm.slane %v234_v45, 0  ;;  %v247_v54 = vperm.slane %v234_v45, 1  ;;  %s289_s7 = sshll.u32 %s176_s13, 4  ;;  %s290_s7 = int_to_ptr.vmem [resolvable:$true] %s289_s7 }
  0x30   : > { %v182_v7 = vadd.f32 %v181_v3, %v714_v2  ;;  %v190_v9 = vadd.f32 %v187_v5, %v186_v4  ;;  %v248_v56 = vperm.slane %v234_v45, 2  ;;  %v249_v57 = vperm.slane %v234_v45, 3  ;;  %s291_s8 = sshll.u32 %s287_s6, 4  ;;  %s276_s14 = scalar_lea.sflag [#allocation4], %s696_s28  ;;  %s292_s8 = int_to_ptr.hbm [resolvable:$true] %s291_s8 }
  0x31   : > { %v259_v59 = vperm.slane %v236_v50, 0  ;;  %v260_v60 = vperm.slane %v236_v50, 1  ;;  %v261_v61 = vperm.slane %v236_v50, 2  ;;  %s528_s17 = sshra.s32 %s292_s8, 4  ;;  %s534_s22 = scalar_lea.hbm %s771_s2, 64  ;;  %s529_s17 = int_to_ptr.hbm [resolvable:$true] %s528_s17 }
  0x32   : > { %v183_v10 = vadd.f32 %v182_v7, %v722_v6  ;;  %v191_v12 = vadd.f32 %v190_v9, %v188_v8  ;;  %s530_s18 = scalar_lea.hbm %s529_s17, 32  ;;  %p535_p9 = scmp.lt.s32.totalorder %s529_s17, %s771_s2 }
  0x33   : > { %p531_p1 = scmp.ne.s32.totalorder %s529_s17, %s530_s18  ;;  %p536_p10 = scmp.lt.s32.totalorder %s534_s22, %s530_s18 }
  0x34   : > { %184 = vadd.xlane.f32.xlu0 %v183_v10  ;;  %v192_v13 = vadd.f32 %v191_v12, %v189_v11  ;;  %v449_v15 = vpop.eup %448 }
  0x35   : > { %v199_v16 = vmul.f32 511.0, %v449_v15  ;;  %vm203_vm0 = vweird.f32 %v449_v15  ;;  %p532_p4 = pnand %p531_p1, %p669_p3  ;;  %p537_p2 = por %p536_p10, %p535_p9 }
  0x37   : > { %v200_v17 = vsub.f32 1.0, %v199_v16  ;;  %p533_p8 = pneg %p532_p4 }
  0x39   : > { %v201_v19 = vmul.f32 %v449_v15, %v200_v17  ;;  %p538_p11 = pnand %p537_p2, %p533_p8 }
  0x3b   : > { %v202_v21 = vadd.f32 %v449_v15, %v201_v19 }
  0x3c   : > { %193 = vadd.xlane.f32.xlu0 %v192_v13 }
  0x3d   : > { %v204_v23 = vsel %vm203_vm0, %v449_v15, %v202_v21 }
  0xa7   : > { %v185_v18 = vpop.xlane.xlu0 %184 }
  0xa8   : > { %v195_v20 = vmul.f32 0.001953125, %v185_v18 }
  0xaa   : > { %v196_v22 = vmul.f32 %v195_v20, %v185_v18  ;;  %v237_v46 = vsub.f32 %v710_v0, %v195_v20  ;;  %v238_v47 = vsub.f32 %v712_v1, %v195_v20  ;;  %v239_v48 = vsub.f32 %v714_v2, %v195_v20 }
  0xab   : > { %v240_v51 = vsub.f32 %v722_v6, %v195_v20  ;;  %v262_v2 = vperm.slane %v236_v50, 3 }
  0xaf   : > { %v194_v24 = vpop.xlane.xlu0 %193 }
  0xb0   : > { %v197_v25 = vsub.f32 %v194_v24, %v196_v22 }
  0xb2   : > { %v205_v26 = vmul.f32 %v204_v23, %v197_v25 }
  0xb4   : > { %v206_v27 = vmax.f32 %v205_v26, 0.0 }
  0xb6   : > { %450 = vrsqrt.f32 %v206_v27  ;;  %vm214_vm1 = vcmp.eq.f32.partialorder %v206_v27, inf  ;;  %v217_v35 = vand.u32 2147483648, %v206_v27  ;;  %vm216_vm2 = vcmp.eq.f32.partialorder %v206_v27, 0.0 }
  0xbc   : > { %v451_v28 = vpop.eup %450 }
  0xbd   : > { %v208_v29 = vmul.f32 %v451_v28, %v206_v27 }
  0xbf   : > { %v209_v30 = vmul.f32 %v451_v28, %v208_v29 }
  0xc1   : > { %v210_v31 = vmul.f32 0.5, %v209_v30 }
  0xc3   : > { %v211_v32 = vsub.f32 1.5, %v210_v31 }
  0xc5   : > { %v212_v33 = vmul.f32 %v451_v28, %v211_v32 }
  0xc7   : > { %v213_v34 = vmul.f32 %v212_v33, %v206_v27 }
  0xc9   : > { %v215_v36 = vsel %vm214_vm1, %v206_v27, %v213_v34 }
  0xca   : > { %v218_v37 = vsel %vm216_vm2, %v217_v35, %v215_v36 }
  0xcb   : > { %v219_v38 = vadd.f32 1000000.0, %v218_v37 }
  0xcd   : > { %452 = vrcp.f32 %v219_v38  ;;  %v231_v42 = vand.u32 2147483648, %v219_v38  ;;  %v229_v44 = vand.u32 2147483647, %v219_v38  ;;  %vm225_vm4 = vweird.f32 %v219_v38 }
  0xcf   : > { %v232_v52 = vor.u32 1.1754944e-38, %v231_v42  ;;  %vm230_vm6 = vcmp.eq.f32.partialorder %v229_v44, 8.507059e+37 }
  0xd3   : > { %v453_v39 = vpop.eup %452 }
  0xd4   : > { %v221_v40 = vmul.f32 %v453_v39, %v219_v38  ;;  %vm226_vm3 = vweird.f32 %v453_v39 }
  0xd5   : > { %vm227_vm5 = vmor %vm225_vm4, %vm226_vm3 }
  0xd6   : > { %v222_v41 = vsub.f32 1.0, %v221_v40 }
  0xd8   : > { %v223_v43 = vmul.f32 %v453_v39, %v222_v41 }
  0xda   : > { %v224_v49 = vadd.f32 %v453_v39, %v223_v43 }
  0xdc   : > { %v228_v55 = vsel %vm227_vm5, %v453_v39, %v224_v49 }
  0xdd   : > { %v233_v58 = vsel %vm230_vm6, %v232_v52, %v228_v55 }
  0xde   : > { %v241_v62 = vmul.f32 %v237_v46, %v233_v58  ;;  %v242_v63 = vmul.f32 %v238_v47, %v233_v58  ;;  %v243_v0 = vmul.f32 %v239_v48, %v233_v58  ;;  %v244_v1 = vmul.f32 %v240_v51, %v233_v58 }
  0xe0   : > { %v254_v3 = vmul.f32 %v246_v53, %v241_v62  ;;  %v255_v4 = vmul.f32 %v247_v54, %v242_v63  ;;  %v256_v5 = vmul.f32 %v248_v56, %v243_v0  ;;  %v257_v6 = vmul.f32 %v249_v57, %v244_v1 }
  0xe2   : > { %v267_v7 = vadd.f32 %v259_v59, %v254_v3  ;;  %v268_v8 = vadd.f32 %v260_v60, %v255_v4  ;;  %v269_v9 = vadd.f32 %v261_v61, %v256_v5  ;;  %v270_v10 = vadd.f32 %v262_v2, %v257_v6 }
  0xe4   : > { %271 = vst [vmem:[%s176_s13] sm:$0xff] %v267_v7 }
  0xe5   : > { %272 = vst [vmem:[%s176_s13 + $0x8] sm:$0xff] %v268_v8 }
  0xe6   : > { %273 = vst [vmem:[%s176_s13 + $0x10] sm:$0xff] %v269_v9 }
  0xe7   : > { %274 = vst [vmem:[%s176_s13 + $0x18] sm:$0xff] %v270_v10 }
  0xe8   : > { %541 = shalt.err (!%p538_p11)
}
  0xe9   : > { %396 = dma.vmem_to_hbm [thread:$0]  (%p669_p3), %s290_s7, 512, %s292_s8, %s276_s14  }
  0xea PF: > { %s303_s29 = sand.u32 1, %s572_s9   ;;  %p777_p12 = scmp.ge.s32.totalorder %s584_s12, 2 }
  0xeb   : > { %s304_s28 = scalar_lea.sflag [#allocation4], %s303_s29 }
  0xec   : > { %p407_p13 = pnand %p777_p12, %p638_p6 }
  0xee   : > { %p408_p0 = pneg %p407_p13 }
  0xf0   : > { %567 = dma.done.wait (%p408_p0), %s304_s28, 512  }
  0xf1   : > { %569 = vsyncadd (%p408_p0), %s304_s28, 4294966784  ;;  %p16_p5 = scmp.ge.s32.totalorder %s656_s23, 4   ;;  %s778_s9 = smov %s576_s10 }
  0xf2   : > { %s779_s10 = smov %s580_s11  ;;  %s780_s11 = smov %s665_s26 }
  0xf3   : > { %s781_s12 = smov %s656_s23  ;;  %18 = sbr.rel (!%p16_p5) target bundleno = 6 (0x6), region = 78 }
  0xf8   :  { %310 = vsyncpa [#allocation3], 1 }
  0xf9   :  { %312 = vsyncpa [#allocation3 + $0x1], 1 }
  0xfa   :  { %313 = vsyncpa [#allocation6], 1 }
  0xfb   :  { %314 = vsyncpa [#allocation4], 1 }
  0xfc   :  { %316 = vsyncpa [#allocation4 + $0x1], 1 }

</bundles_post_ra>
